<compile_context>
chip_gen: v7x
topology: tpu7x:2x2x1
jax: 0.10.0
libtpu: 0.0.40
codegen_flags: <defaults>
</compile_context>

<pallas_src>
import functools

import jax
import jax.numpy as jnp
from jax import lax
from jax.experimental import pallas as pl
from jax.experimental.pallas import tpu as pltpu


# ---------------------------------------------------------------------------
# Pallas kernel: sequential GRU recurrence over a chunk of timesteps.
#   gi_ref : (Tt, Bt, 3H)  precomputed x-projection (b_ih already folded in)
#   whh_ref: (H, 3H)       W_hh^T
#   bhh_ref: (1, 3H)       b_hh
#   out_ref: (Tt, Bt, H)   hidden states for this chunk
#   h_state: (Bt, H) f32   VMEM scratch, persists across time chunks
# ---------------------------------------------------------------------------
def _gru_recurrence_kernel(gi_ref, whh_ref, bhh_ref, out_ref, h_state,
                           *, hidden, chunk):
    t_chunk = pl.program_id(1)  # time-chunk index (innermost grid axis)

    @pl.when(t_chunk == 0)
    def _():
        h_state[...] = jnp.zeros_like(h_state)

    H = hidden
    Bt = h_state.shape[0]

    # Hoisted out of the per-timestep loop (JAX does not CSE broadcasts).
    whh = whh_ref[...].astype(jnp.float32)                         # (H, 3H)
    bhh = jnp.broadcast_to(bhh_ref[...].astype(jnp.float32), (Bt, 3 * H))

    def step(i, h_prev):
        gi = gi_ref[i].astype(jnp.float32)                          # (Bt, 3H)
        gh = jnp.dot(h_prev, whh, preferred_element_type=jnp.float32) + bhh
        # PyTorch gate order: r, z, n ; b_hh sits inside r*( ) for the n gate.
        r = jax.nn.sigmoid(gi[:, 0 * H:1 * H] + gh[:, 0 * H:1 * H])
        z = jax.nn.sigmoid(gi[:, 1 * H:2 * H] + gh[:, 1 * H:2 * H])
        n = jnp.tanh(gi[:, 2 * H:3 * H] + r * gh[:, 2 * H:3 * H])
        h_new = (1.0 - z) * n + z * h_prev
        out_ref[i] = h_new.astype(out_ref.dtype)
        return h_new

    h_final = lax.fori_loop(0, chunk, step, h_state[...], unroll=True)
    h_state[...] = h_final


def _pick_time_chunk(T):
    # 8-32 timesteps per grid step amortizes the ~0.35us fixed overhead.
    return T if T <= 16 else 16


def _pick_batch_tile(B):
    # Split batch across two chunks when it tiles cleanly (megacore on v7x).
    if B >= 16 and B % 16 == 0:
        return B // 2
    return B


def gru_recurrence(gi_tbg, w_hh_t, b_hh, out_dtype):
    """Sequential GRU recurrence.

    gi_tbg : (T, B, 3H) time-major precomputed input projection (incl. b_ih)
    w_hh_t : (H, 3H)
    b_hh   : (1, 3H)
    returns: out (T, B, H) time-major hidden states of this layer
    """
    T, B, G = gi_tbg.shape
    H = w_hh_t.shape[0]
    assert G == 3 * H

    Tt = _pick_time_chunk(T)
    T_pad = ((T + Tt - 1) // Tt) * Tt
    if T_pad != T:
        # Padded steps compute garbage hidden updates past T-1; their outputs
        # are sliced away below and nothing downstream reads them.
        gi_tbg = jnp.pad(gi_tbg, ((0, T_pad - T), (0, 0), (0, 0)))

    Bt = _pick_batch_tile(B)
    n_b = B // Bt
    n_t = T_pad // Tt

    kernel = functools.partial(_gru_recurrence_kernel, hidden=H, chunk=Tt)

    out = pl.pallas_call(
        kernel,
        out_shape=jax.ShapeDtypeStruct((T_pad, B, H), out_dtype),
        grid_spec=pltpu.PrefetchScalarGridSpec(
            num_scalar_prefetch=0,
            grid=(n_b, n_t),                                   # (batch, time)
            in_specs=[
                pl.BlockSpec((Tt, Bt, 3 * H), lambda b, t: (t, b, 0)),  # gi
                pl.BlockSpec((H, 3 * H), lambda b, t: (0, 0)),          # W_hh^T
                pl.BlockSpec((1, 3 * H), lambda b, t: (0, 0)),          # b_hh
            ],
            out_specs=pl.BlockSpec((Tt, Bt, H), lambda b, t: (t, b, 0)),
            scratch_shapes=[pltpu.VMEM((Bt, H), jnp.float32)],  # hidden state
        ),
        compiler_params=pltpu.CompilerParams(
            dimension_semantics=("parallel", "arbitrary")),
    )(gi_tbg, w_hh_t, b_hh)

    return out[:T]


# ---------------------------------------------------------------------------
# TFR wrapper: multi-layer GRU, batch_first interface like the PyTorch module.
# ---------------------------------------------------------------------------
def tfr_forward(x_btd, params):
    """x_btd: (B, T, in_dim).  Returns (out (B,T,H), h_last (B,H))."""
    h_seq = None  # time-major (T, B, H) activations of the current layer
    for layer_idx, (w_ih_t, w_hh_t, b_ih, b_hh) in enumerate(params):
        if layer_idx == 0:
            # One big GEMM over all timesteps; output already time-major, so
            # the batch_first transpose is fused into the GEMM output layout.
            gi = jnp.einsum('btd,dg->tbg', x_btd, w_ih_t,
                            preferred_element_type=jnp.float32) + b_ih
        else:
            gi = jnp.einsum('tbd,dg->tbg', h_seq, w_ih_t,
                            preferred_element_type=jnp.float32) + b_ih
        h_seq = gru_recurrence(gi.astype(x_btd.dtype), w_hh_t, b_hh,
                               out_dtype=x_btd.dtype)
    out = jnp.transpose(h_seq, (1, 0, 2))   # -> (B, T, H)
    h_last = h_seq[-1]                      # == out[:, -1, :] == h[-1]
    return out, h_last


def init_params(key, in_dim, hidden, num_layers, dtype=jnp.float32):
    params = []
    scale = 1.0 / jnp.sqrt(hidden)
    for layer in range(num_layers):
        d_in = in_dim if layer == 0 else hidden
        key, k1, k2, k3, k4 = jax.random.split(key, 5)
        w_ih_t = jax.random.uniform(k1, (d_in, 3 * hidden), dtype, -scale, scale)
        w_hh_t = jax.random.uniform(k2, (hidden, 3 * hidden), dtype, -scale, scale)
        b_ih = jax.random.uniform(k3, (1, 3 * hidden), dtype, -scale, scale)
        b_hh = jax.random.uniform(k4, (1, 3 * hidden), dtype, -scale, scale)
        params.append((w_ih_t, w_hh_t, b_ih, b_hh))
    return params


# ---------------------------------------------------------------------------
# Pure-JAX reference (lax.scan) for correctness checking.
# ---------------------------------------------------------------------------
def tfr_reference(x_btd, params):
    x = jnp.transpose(x_btd, (1, 0, 2))
    h_last = None
    for (w_ih_t, w_hh_t, b_ih, b_hh) in params:
        H = w_hh_t.shape[0]
        B = x.shape[1]

        def step(h_prev, x_t):
            gi = x_t @ w_ih_t + b_ih
            gh = h_prev @ w_hh_t + b_hh
            r = jax.nn.sigmoid(gi[:, :H] + gh[:, :H])
            z = jax.nn.sigmoid(gi[:, H:2 * H] + gh[:, H:2 * H])
            n = jnp.tanh(gi[:, 2 * H:] + r * gh[:, 2 * H:])
            h = (1.0 - z) * n + z * h_prev
            return h, h

        h0 = jnp.zeros((B, H), x.dtype)
        h_last, x = lax.scan(step, h0, x)
    return jnp.transpose(x, (1, 0, 2)), h_last


if __name__ == "__main__":
    B, T, IN_DIM, HIDDEN, NUM_LAYERS = 2, 8, 16, 32, 2

    key = jax.random.PRNGKey(0)
    key, kx = jax.random.split(key)
    x = jax.random.normal(kx, (B, T, IN_DIM), jnp.float32)
    params = init_params(key, IN_DIM, HIDDEN, NUM_LAYERS)

    out, h_last = jax.jit(tfr_forward)(x, params)
    out = jax.block_until_ready(out)
    h_last = jax.block_until_ready(h_last)

    out_ref, h_ref = tfr_reference(x, params)
    assert out.shape == (B, T, HIDDEN) and h_last.shape == (B, HIDDEN)
    assert jnp.allclose(out, out_ref, atol=1e-4, rtol=1e-4)
    assert jnp.allclose(h_last, h_ref, atol=1e-4, rtol=1e-4)

    print("KERNEL_OK")
</pallas_src>

<mosaic_0001>
module attributes {stable_mosaic.version = 11 : i64} {
  func.func @_gru_recurrence_kernel(%arg0: i32, %arg1: i32, %arg2: memref<8x2x96xf32, #tpu.memory_space<vmem>>, %arg3: memref<32x96xf32, #tpu.memory_space<vmem>>, %arg4: memref<1x96xf32, #tpu.memory_space<vmem>>, %arg5: memref<8x2x32xf32, #tpu.memory_space<vmem>>, %arg6: memref<2x32xf32, #tpu.memory_space<vmem>>) attributes {dimension_semantics = [#tpu.dimension_semantics<parallel>, #tpu.dimension_semantics<arbitrary>], iteration_bounds = array<i64: 1, 1>, scalar_prefetch = 0 : i64, scratch_operands = 1 : i64, tpu.core_type = #tpu.core_type<tc>, window_params = [{transform_indices = @transform_0, window_bounds = array<i64: 8, 2, 96>}, {pipeline_mode = #tpu.pipeline_mode<synchronous>, transform_indices = @transform_1, window_bounds = array<i64: 32, 96>}, {pipeline_mode = #tpu.pipeline_mode<synchronous>, transform_indices = @transform_2, window_bounds = array<i64: 1, 96>}, {transform_indices = @transform_3, window_bounds = array<i64: 8, 2, 32>}]} {
    %c0_i32 = arith.constant 0 : i32
    %0 = arith.cmpi eq, %arg1, %c0_i32 : i32
    %1 = arith.extui %0 : i1 to i32
    %c0_i32_0 = arith.constant 0 : i32
    %2 = arith.cmpi ne, %1, %c0_i32_0 : i32
    scf.if %2 {
      %cst_72 = arith.constant 0.000000e+00 : f32
      %289 = vector.broadcast %cst_72 : f32 to vector<2x32xf32>
      %c0_73 = arith.constant 0 : index
      %c0_74 = arith.constant 0 : index
      %290 = vector.load %arg6[%c0_73, %c0_74] : memref<2x32xf32, #tpu.memory_space<vmem>>, vector<2x32xf32>
      tpu.vector_store %arg6[%c0_73, %c0_74], %289 {strides = array<i32>} : memref<2x32xf32, #tpu.memory_space<vmem>>, vector<2x32xf32>,
    } else {
    }
    %c0 = arith.constant 0 : index
    %c0_1 = arith.constant 0 : index
    %3 = vector.load %arg3[%c0, %c0_1] : memref<32x96xf32, #tpu.memory_space<vmem>>, vector<32x96xf32>
    %c0_2 = arith.constant 0 : index
    %c0_3 = arith.constant 0 : index
    %4 = vector.load %arg4[%c0_2, %c0_3] : memref<1x96xf32, #tpu.memory_space<vmem>>, vector<1x96xf32>
    %5 = vector.shape_cast %4 : vector<1x96xf32> to vector<1x96xf32>
    %6 = vector.broadcast %5 : vector<1x96xf32> to vector<2x96xf32>
    %c0_4 = arith.constant 0 : index
    %c0_5 = arith.constant 0 : index
    %7 = vector.load %arg6[%c0_4, %c0_5] : memref<2x32xf32, #tpu.memory_space<vmem>>, vector<2x32xf32>
    %c0_i32_6 = arith.constant 0 : i32
    %8 = arith.index_cast %c0_i32_6 : i32 to index
    %c0_7 = arith.constant 0 : index
    %c0_8 = arith.constant 0 : index
    %9 = vector.load %arg2[%8, %c0_7, %c0_8] : memref<8x2x96xf32, #tpu.memory_space<vmem>>, vector<1x2x96xf32>
    %10 = vector.shape_cast %9 : vector<1x2x96xf32> to vector<2x96xf32>
    %cst = arith.constant dense<0.000000e+00> : vector<2x96xf32>
    %11 = tpu.matmul %7, %3, %cst {dimension_numbers = #tpu.dot_dimension_numbers<[1], [0], [0], [1], [0, 0, 1, 1], [], []>} : vector<2x32xf32>, vector<32x96xf32>, vector<2x96xf32> -> vector<2x96xf32>
    %12 = arith.addf %11, %6 : vector<2x96xf32>
    %13 = vector.extract_strided_slice %10 {offsets = [0, 0], sizes = [2, 32], strides = [1, 1]} : vector<2x96xf32> to vector<2x32xf32>
    %14 = vector.extract_strided_slice %12 {offsets = [0, 0], sizes = [2, 32], strides = [1, 1]} : vector<2x96xf32> to vector<2x32xf32>
    %15 = arith.addf %13, %14 : vector<2x32xf32>
    %16 = arith.negf %15 : vector<2x32xf32>
    %17 = math.exp %16 : vector<2x32xf32>
    %cst_9 = arith.constant 1.000000e+00 : f32
    %18 = vector.broadcast %cst_9 : f32 to vector<2x32xf32>
    %19 = arith.addf %18, %17 : vector<2x32xf32>
    %20 = arith.divf %18, %19 : vector<2x32xf32>
    %21 = vector.extract_strided_slice %10 {offsets = [0, 32], sizes = [2, 32], strides = [1, 1]} : vector<2x96xf32> to vector<2x32xf32>
    %22 = vector.extract_strided_slice %12 {offsets = [0, 32], sizes = [2, 32], strides = [1, 1]} : vector<2x96xf32> to vector<2x32xf32>
    %23 = arith.addf %21, %22 : vector<2x32xf32>
    %24 = arith.negf %23 : vector<2x32xf32>
    %25 = math.exp %24 : vector<2x32xf32>
    %cst_10 = arith.constant 1.000000e+00 : f32
    %26 = vector.broadcast %cst_10 : f32 to vector<2x32xf32>
    %27 = arith.addf %26, %25 : vector<2x32xf32>
    %28 = arith.divf %26, %27 : vector<2x32xf32>
    %29 = vector.extract_strided_slice %10 {offsets = [0, 64], sizes = [2, 32], strides = [1, 1]} : vector<2x96xf32> to vector<2x32xf32>
    %30 = vector.extract_strided_slice %12 {offsets = [0, 64], sizes = [2, 32], strides = [1, 1]} : vector<2x96xf32> to vector<2x32xf32>
    %31 = arith.mulf %20, %30 : vector<2x32xf32>
    %32 = arith.addf %29, %31 : vector<2x32xf32>
    %33 = math.tanh %32 : vector<2x32xf32>
    %cst_11 = arith.constant 1.000000e+00 : f32
    %34 = vector.broadcast %cst_11 : f32 to vector<2x32xf32>
    %35 = arith.subf %34, %28 : vector<2x32xf32>
    %36 = arith.mulf %35, %33 : vector<2x32xf32>
    %37 = arith.mulf %28, %7 : vector<2x32xf32>
    %38 = arith.addf %36, %37 : vector<2x32xf32>
    %39 = arith.index_cast %c0_i32_6 : i32 to index
    %c0_12 = arith.constant 0 : index
    %c0_13 = arith.constant 0 : index
    %40 = vector.load %arg5[%39, %c0_12, %c0_13] : memref<8x2x32xf32, #tpu.memory_space<vmem>>, vector<1x2x32xf32>
    %41 = vector.shape_cast %40 : vector<1x2x32xf32> to vector<2x32xf32>
    %42 = vector.shape_cast %38 : vector<2x32xf32> to vector<1x2x32xf32>
    tpu.vector_store %arg5[%39, %c0_12, %c0_13], %42 {strides = array<i32>} : memref<8x2x32xf32, #tpu.memory_space<vmem>>, vector<1x2x32xf32>,
    %c1_i32 = arith.constant 1 : i32
    %43 = arith.index_cast %c1_i32 : i32 to index
    %c0_14 = arith.constant 0 : index
    %c0_15 = arith.constant 0 : index
    %44 = vector.load %arg2[%43, %c0_14, %c0_15] : memref<8x2x96xf32, #tpu.memory_space<vmem>>, vector<1x2x96xf32>
    %45 = vector.shape_cast %44 : vector<1x2x96xf32> to vector<2x96xf32>
    %cst_16 = arith.constant dense<0.000000e+00> : vector<2x96xf32>
    %46 = tpu.matmul %38, %3, %cst_16 {dimension_numbers = #tpu.dot_dimension_numbers<[1], [0], [0], [1], [0, 0, 1, 1], [], []>} : vector<2x32xf32>, vector<32x96xf32>, vector<2x96xf32> -> vector<2x96xf32>
    %47 = arith.addf %46, %6 : vector<2x96xf32>
    %48 = vector.extract_strided_slice %45 {offsets = [0, 0], sizes = [2, 32], strides = [1, 1]} : vector<2x96xf32> to vector<2x32xf32>
    %49 = vector.extract_strided_slice %47 {offsets = [0, 0], sizes = [2, 32], strides = [1, 1]} : vector<2x96xf32> to vector<2x32xf32>
    %50 = arith.addf %48, %49 : vector<2x32xf32>
    %51 = arith.negf %50 : vector<2x32xf32>
    %52 = math.exp %51 : vector<2x32xf32>
    %cst_17 = arith.constant 1.000000e+00 : f32
    %53 = vector.broadcast %cst_17 : f32 to vector<2x32xf32>
    %54 = arith.addf %53, %52 : vector<2x32xf32>
    %55 = arith.divf %53, %54 : vector<2x32xf32>
    %56 = vector.extract_strided_slice %45 {offsets = [0, 32], sizes = [2, 32], strides = [1, 1]} : vector<2x96xf32> to vector<2x32xf32>
    %57 = vector.extract_strided_slice %47 {offsets = [0, 32], sizes = [2, 32], strides = [1, 1]} : vector<2x96xf32> to vector<2x32xf32>
    %58 = arith.addf %56, %57 : vector<2x32xf32>
    %59 = arith.negf %58 : vector<2x32xf32>
    %60 = math.exp %59 : vector<2x32xf32>
    %cst_18 = arith.constant 1.000000e+00 : f32
    %61 = vector.broadcast %cst_18 : f32 to vector<2x32xf32>
    %62 = arith.addf %61, %60 : vector<2x32xf32>
    %63 = arith.divf %61, %62 : vector<2x32xf32>
    %64 = vector.extract_strided_slice %45 {offsets = [0, 64], sizes = [2, 32], strides = [1, 1]} : vector<2x96xf32> to vector<2x32xf32>
    %65 = vector.extract_strided_slice %47 {offsets = [0, 64], sizes = [2, 32], strides = [1, 1]} : vector<2x96xf32> to vector<2x32xf32>
    %66 = arith.mulf %55, %65 : vector<2x32xf32>
    %67 = arith.addf %64, %66 : vector<2x32xf32>
    %68 = math.tanh %67 : vector<2x32xf32>
    %cst_19 = arith.constant 1.000000e+00 : f32
    %69 = vector.broadcast %cst_19 : f32 to vector<2x32xf32>
    %70 = arith.subf %69, %63 : vector<2x32xf32>
    %71 = arith.mulf %70, %68 : vector<2x32xf32>
    %72 = arith.mulf %63, %38 : vector<2x32xf32>
    %73 = arith.addf %71, %72 : vector<2x32xf32>
    %74 = arith.index_cast %c1_i32 : i32 to index
    %c0_20 = arith.constant 0 : index
    %c0_21 = arith.constant 0 : index
    %75 = vector.load %arg5[%74, %c0_20, %c0_21] : memref<8x2x32xf32, #tpu.memory_space<vmem>>, vector<1x2x32xf32>
    %76 = vector.shape_cast %75 : vector<1x2x32xf32> to vector<2x32xf32>
    %77 = vector.shape_cast %73 : vector<2x32xf32> to vector<1x2x32xf32>
    tpu.vector_store %arg5[%74, %c0_20, %c0_21], %77 {strides = array<i32>} : memref<8x2x32xf32, #tpu.memory_space<vmem>>, vector<1x2x32xf32>,
    %c2_i32 = arith.constant 2 : i32
    %78 = arith.index_cast %c2_i32 : i32 to index
    %c0_22 = arith.constant 0 : index
    %c0_23 = arith.constant 0 : index
    %79 = vector.load %arg2[%78, %c0_22, %c0_23] : memref<8x2x96xf32, #tpu.memory_space<vmem>>, vector<1x2x96xf32>
    %80 = vector.shape_cast %79 : vector<1x2x96xf32> to vector<2x96xf32>
    %cst_24 = arith.constant dense<0.000000e+00> : vector<2x96xf32>
    %81 = tpu.matmul %73, %3, %cst_24 {dimension_numbers = #tpu.dot_dimension_numbers<[1], [0], [0], [1], [0, 0, 1, 1], [], []>} : vector<2x32xf32>, vector<32x96xf32>, vector<2x96xf32> -> vector<2x96xf32>
    %82 = arith.addf %81, %6 : vector<2x96xf32>
    %83 = vector.extract_strided_slice %80 {offsets = [0, 0], sizes = [2, 32], strides = [1, 1]} : vector<2x96xf32> to vector<2x32xf32>
    %84 = vector.extract_strided_slice %82 {offsets = [0, 0], sizes = [2, 32], strides = [1, 1]} : vector<2x96xf32> to vector<2x32xf32>
    %85 = arith.addf %83, %84 : vector<2x32xf32>
    %86 = arith.negf %85 : vector<2x32xf32>
    %87 = math.exp %86 : vector<2x32xf32>
    %cst_25 = arith.constant 1.000000e+00 : f32
    %88 = vector.broadcast %cst_25 : f32 to vector<2x32xf32>
    %89 = arith.addf %88, %87 : vector<2x32xf32>
    %90 = arith.divf %88, %89 : vector<2x32xf32>
    %91 = vector.extract_strided_slice %80 {offsets = [0, 32], sizes = [2, 32], strides = [1, 1]} : vector<2x96xf32> to vector<2x32xf32>
    %92 = vector.extract_strided_slice %82 {offsets = [0, 32], sizes = [2, 32], strides = [1, 1]} : vector<2x96xf32> to vector<2x32xf32>
    %93 = arith.addf %91, %92 : vector<2x32xf32>
    %94 = arith.negf %93 : vector<2x32xf32>
    %95 = math.exp %94 : vector<2x32xf32>
    %cst_26 = arith.constant 1.000000e+00 : f32
    %96 = vector.broadcast %cst_26 : f32 to vector<2x32xf32>
    %97 = arith.addf %96, %95 : vector<2x32xf32>
    %98 = arith.divf %96, %97 : vector<2x32xf32>
    %99 = vector.extract_strided_slice %80 {offsets = [0, 64], sizes = [2, 32], strides = [1, 1]} : vector<2x96xf32> to vector<2x32xf32>
    %100 = vector.extract_strided_slice %82 {offsets = [0, 64], sizes = [2, 32], strides = [1, 1]} : vector<2x96xf32> to vector<2x32xf32>
    %101 = arith.mulf %90, %100 : vector<2x32xf32>
    %102 = arith.addf %99, %101 : vector<2x32xf32>
    %103 = math.tanh %102 : vector<2x32xf32>
    %cst_27 = arith.constant 1.000000e+00 : f32
    %104 = vector.broadcast %cst_27 : f32 to vector<2x32xf32>
    %105 = arith.subf %104, %98 : vector<2x32xf32>
    %106 = arith.mulf %105, %103 : vector<2x32xf32>
    %107 = arith.mulf %98, %73 : vector<2x32xf32>
    %108 = arith.addf %106, %107 : vector<2x32xf32>
    %109 = arith.index_cast %c2_i32 : i32 to index
    %c0_28 = arith.constant 0 : index
    %c0_29 = arith.constant 0 : index
    %110 = vector.load %arg5[%109, %c0_28, %c0_29] : memref<8x2x32xf32, #tpu.memory_space<vmem>>, vector<1x2x32xf32>
    %111 = vector.shape_cast %110 : vector<1x2x32xf32> to vector<2x32xf32>
    %112 = vector.shape_cast %108 : vector<2x32xf32> to vector<1x2x32xf32>
    tpu.vector_store %arg5[%109, %c0_28, %c0_29], %112 {strides = array<i32>} : memref<8x2x32xf32, #tpu.memory_space<vmem>>, vector<1x2x32xf32>,
    %c3_i32 = arith.constant 3 : i32
    %113 = arith.index_cast %c3_i32 : i32 to index
    %c0_30 = arith.constant 0 : index
    %c0_31 = arith.constant 0 : index
    %114 = vector.load %arg2[%113, %c0_30, %c0_31] : memref<8x2x96xf32, #tpu.memory_space<vmem>>, vector<1x2x96xf32>
    %115 = vector.shape_cast %114 : vector<1x2x96xf32> to vector<2x96xf32>
    %cst_32 = arith.constant dense<0.000000e+00> : vector<2x96xf32>
    %116 = tpu.matmul %108, %3, %cst_32 {dimension_numbers = #tpu.dot_dimension_numbers<[1], [0], [0], [1], [0, 0, 1, 1], [], []>} : vector<2x32xf32>, vector<32x96xf32>, vector<2x96xf32> -> vector<2x96xf32>
    %117 = arith.addf %116, %6 : vector<2x96xf32>
    %118 = vector.extract_strided_slice %115 {offsets = [0, 0], sizes = [2, 32], strides = [1, 1]} : vector<2x96xf32> to vector<2x32xf32>
    %119 = vector.extract_strided_slice %117 {offsets = [0, 0], sizes = [2, 32], strides = [1, 1]} : vector<2x96xf32> to vector<2x32xf32>
    %120 = arith.addf %118, %119 : vector<2x32xf32>
    %121 = arith.negf %120 : vector<2x32xf32>
    %122 = math.exp %121 : vector<2x32xf32>
    %cst_33 = arith.constant 1.000000e+00 : f32
    %123 = vector.broadcast %cst_33 : f32 to vector<2x32xf32>
    %124 = arith.addf %123, %122 : vector<2x32xf32>
    %125 = arith.divf %123, %124 : vector<2x32xf32>
    %126 = vector.extract_strided_slice %115 {offsets = [0, 32], sizes = [2, 32], strides = [1, 1]} : vector<2x96xf32> to vector<2x32xf32>
    %127 = vector.extract_strided_slice %117 {offsets = [0, 32], sizes = [2, 32], strides = [1, 1]} : vector<2x96xf32> to vector<2x32xf32>
    %128 = arith.addf %126, %127 : vector<2x32xf32>
    %129 = arith.negf %128 : vector<2x32xf32>
    %130 = math.exp %129 : vector<2x32xf32>
    %cst_34 = arith.constant 1.000000e+00 : f32
    %131 = vector.broadcast %cst_34 : f32 to vector<2x32xf32>
    %132 = arith.addf %131, %130 : vector<2x32xf32>
    %133 = arith.divf %131, %132 : vector<2x32xf32>
    %134 = vector.extract_strided_slice %115 {offsets = [0, 64], sizes = [2, 32], strides = [1, 1]} : vector<2x96xf32> to vector<2x32xf32>
    %135 = vector.extract_strided_slice %117 {offsets = [0, 64], sizes = [2, 32], strides = [1, 1]} : vector<2x96xf32> to vector<2x32xf32>
    %136 = arith.mulf %125, %135 : vector<2x32xf32>
    %137 = arith.addf %134, %136 : vector<2x32xf32>
    %138 = math.tanh %137 : vector<2x32xf32>
    %cst_35 = arith.constant 1.000000e+00 : f32
    %139 = vector.broadcast %cst_35 : f32 to vector<2x32xf32>
    %140 = arith.subf %139, %133 : vector<2x32xf32>
    %141 = arith.mulf %140, %138 : vector<2x32xf32>
    %142 = arith.mulf %133, %108 : vector<2x32xf32>
    %143 = arith.addf %141, %142 : vector<2x32xf32>
    %144 = arith.index_cast %c3_i32 : i32 to index
    %c0_36 = arith.constant 0 : index
    %c0_37 = arith.constant 0 : index
    %145 = vector.load %arg5[%144, %c0_36, %c0_37] : memref<8x2x32xf32, #tpu.memory_space<vmem>>, vector<1x2x32xf32>
    %146 = vector.shape_cast %145 : vector<1x2x32xf32> to vector<2x32xf32>
    %147 = vector.shape_cast %143 : vector<2x32xf32> to vector<1x2x32xf32>
    tpu.vector_store %arg5[%144, %c0_36, %c0_37], %147 {strides = array<i32>} : memref<8x2x32xf32, #tpu.memory_space<vmem>>, vector<1x2x32xf32>,
    %c4_i32 = arith.constant 4 : i32
    %148 = arith.index_cast %c4_i32 : i32 to index
    %c0_38 = arith.constant 0 : index
    %c0_39 = arith.constant 0 : index
    %149 = vector.load %arg2[%148, %c0_38, %c0_39] : memref<8x2x96xf32, #tpu.memory_space<vmem>>, vector<1x2x96xf32>
    %150 = vector.shape_cast %149 : vector<1x2x96xf32> to vector<2x96xf32>
    %cst_40 = arith.constant dense<0.000000e+00> : vector<2x96xf32>
    %151 = tpu.matmul %143, %3, %cst_40 {dimension_numbers = #tpu.dot_dimension_numbers<[1], [0], [0], [1], [0, 0, 1, 1], [], []>} : vector<2x32xf32>, vector<32x96xf32>, vector<2x96xf32> -> vector<2x96xf32>
    %152 = arith.addf %151, %6 : vector<2x96xf32>
    %153 = vector.extract_strided_slice %150 {offsets = [0, 0], sizes = [2, 32], strides = [1, 1]} : vector<2x96xf32> to vector<2x32xf32>
    %154 = vector.extract_strided_slice %152 {offsets = [0, 0], sizes = [2, 32], strides = [1, 1]} : vector<2x96xf32> to vector<2x32xf32>
    %155 = arith.addf %153, %154 : vector<2x32xf32>
    %156 = arith.negf %155 : vector<2x32xf32>
    %157 = math.exp %156 : vector<2x32xf32>
    %cst_41 = arith.constant 1.000000e+00 : f32
    %158 = vector.broadcast %cst_41 : f32 to vector<2x32xf32>
    %159 = arith.addf %158, %157 : vector<2x32xf32>
    %160 = arith.divf %158, %159 : vector<2x32xf32>
    %161 = vector.extract_strided_slice %150 {offsets = [0, 32], sizes = [2, 32], strides = [1, 1]} : vector<2x96xf32> to vector<2x32xf32>
    %162 = vector.extract_strided_slice %152 {offsets = [0, 32], sizes = [2, 32], strides = [1, 1]} : vector<2x96xf32> to vector<2x32xf32>
    %163 = arith.addf %161, %162 : vector<2x32xf32>
    %164 = arith.negf %163 : vector<2x32xf32>
    %165 = math.exp %164 : vector<2x32xf32>
    %cst_42 = arith.constant 1.000000e+00 : f32
    %166 = vector.broadcast %cst_42 : f32 to vector<2x32xf32>
    %167 = arith.addf %166, %165 : vector<2x32xf32>
    %168 = arith.divf %166, %167 : vector<2x32xf32>
    %169 = vector.extract_strided_slice %150 {offsets = [0, 64], sizes = [2, 32], strides = [1, 1]} : vector<2x96xf32> to vector<2x32xf32>
    %170 = vector.extract_strided_slice %152 {offsets = [0, 64], sizes = [2, 32], strides = [1, 1]} : vector<2x96xf32> to vector<2x32xf32>
    %171 = arith.mulf %160, %170 : vector<2x32xf32>
    %172 = arith.addf %169, %171 : vector<2x32xf32>
    %173 = math.tanh %172 : vector<2x32xf32>
    %cst_43 = arith.constant 1.000000e+00 : f32
    %174 = vector.broadcast %cst_43 : f32 to vector<2x32xf32>
    %175 = arith.subf %174, %168 : vector<2x32xf32>
    %176 = arith.mulf %175, %173 : vector<2x32xf32>
    %177 = arith.mulf %168, %143 : vector<2x32xf32>
    %178 = arith.addf %176, %177 : vector<2x32xf32>
    %179 = arith.index_cast %c4_i32 : i32 to index
    %c0_44 = arith.constant 0 : index
    %c0_45 = arith.constant 0 : index
    %180 = vector.load %arg5[%179, %c0_44, %c0_45] : memref<8x2x32xf32, #tpu.memory_space<vmem>>, vector<1x2x32xf32>
    %181 = vector.shape_cast %180 : vector<1x2x32xf32> to vector<2x32xf32>
    %182 = vector.shape_cast %178 : vector<2x32xf32> to vector<1x2x32xf32>
    tpu.vector_store %arg5[%179, %c0_44, %c0_45], %182 {strides = array<i32>} : memref<8x2x32xf32, #tpu.memory_space<vmem>>, vector<1x2x32xf32>,
    %c5_i32 = arith.constant 5 : i32
    %183 = arith.index_cast %c5_i32 : i32 to index
    %c0_46 = arith.constant 0 : index
    %c0_47 = arith.constant 0 : index
    %184 = vector.load %arg2[%183, %c0_46, %c0_47] : memref<8x2x96xf32, #tpu.memory_space<vmem>>, vector<1x2x96xf32>
    %185 = vector.shape_cast %184 : vector<1x2x96xf32> to vector<2x96xf32>
    %cst_48 = arith.constant dense<0.000000e+00> : vector<2x96xf32>
    %186 = tpu.matmul %178, %3, %cst_48 {dimension_numbers = #tpu.dot_dimension_numbers<[1], [0], [0], [1], [0, 0, 1, 1], [], []>} : vector<2x32xf32>, vector<32x96xf32>, vector<2x96xf32> -> vector<2x96xf32>
    %187 = arith.addf %186, %6 : vector<2x96xf32>
    %188 = vector.extract_strided_slice %185 {offsets = [0, 0], sizes = [2, 32], strides = [1, 1]} : vector<2x96xf32> to vector<2x32xf32>
    %189 = vector.extract_strided_slice %187 {offsets = [0, 0], sizes = [2, 32], strides = [1, 1]} : vector<2x96xf32> to vector<2x32xf32>
    %190 = arith.addf %188, %189 : vector<2x32xf32>
    %191 = arith.negf %190 : vector<2x32xf32>
    %192 = math.exp %191 : vector<2x32xf32>
    %cst_49 = arith.constant 1.000000e+00 : f32
    %193 = vector.broadcast %cst_49 : f32 to vector<2x32xf32>
    %194 = arith.addf %193, %192 : vector<2x32xf32>
    %195 = arith.divf %193, %194 : vector<2x32xf32>
    %196 = vector.extract_strided_slice %185 {offsets = [0, 32], sizes = [2, 32], strides = [1, 1]} : vector<2x96xf32> to vector<2x32xf32>
    %197 = vector.extract_strided_slice %187 {offsets = [0, 32], sizes = [2, 32], strides = [1, 1]} : vector<2x96xf32> to vector<2x32xf32>
    %198 = arith.addf %196, %197 : vector<2x32xf32>
    %199 = arith.negf %198 : vector<2x32xf32>
    %200 = math.exp %199 : vector<2x32xf32>
    %cst_50 = arith.constant 1.000000e+00 : f32
    %201 = vector.broadcast %cst_50 : f32 to vector<2x32xf32>
    %202 = arith.addf %201, %200 : vector<2x32xf32>
    %203 = arith.divf %201, %202 : vector<2x32xf32>
    %204 = vector.extract_strided_slice %185 {offsets = [0, 64], sizes = [2, 32], strides = [1, 1]} : vector<2x96xf32> to vector<2x32xf32>
    %205 = vector.extract_strided_slice %187 {offsets = [0, 64], sizes = [2, 32], strides = [1, 1]} : vector<2x96xf32> to vector<2x32xf32>
    %206 = arith.mulf %195, %205 : vector<2x32xf32>
    %207 = arith.addf %204, %206 : vector<2x32xf32>
    %208 = math.tanh %207 : vector<2x32xf32>
    %cst_51 = arith.constant 1.000000e+00 : f32
    %209 = vector.broadcast %cst_51 : f32 to vector<2x32xf32>
    %210 = arith.subf %209, %203 : vector<2x32xf32>
    %211 = arith.mulf %210, %208 : vector<2x32xf32>
    %212 = arith.mulf %203, %178 : vector<2x32xf32>
    %213 = arith.addf %211, %212 : vector<2x32xf32>
    %214 = arith.index_cast %c5_i32 : i32 to index
    %c0_52 = arith.constant 0 : index
    %c0_53 = arith.constant 0 : index
    %215 = vector.load %arg5[%214, %c0_52, %c0_53] : memref<8x2x32xf32, #tpu.memory_space<vmem>>, vector<1x2x32xf32>
    %216 = vector.shape_cast %215 : vector<1x2x32xf32> to vector<2x32xf32>
    %217 = vector.shape_cast %213 : vector<2x32xf32> to vector<1x2x32xf32>
    tpu.vector_store %arg5[%214, %c0_52, %c0_53], %217 {strides = array<i32>} : memref<8x2x32xf32, #tpu.memory_space<vmem>>, vector<1x2x32xf32>,
    %c6_i32 = arith.constant 6 : i32
    %218 = arith.index_cast %c6_i32 : i32 to index
    %c0_54 = arith.constant 0 : index
    %c0_55 = arith.constant 0 : index
    %219 = vector.load %arg2[%218, %c0_54, %c0_55] : memref<8x2x96xf32, #tpu.memory_space<vmem>>, vector<1x2x96xf32>
    %220 = vector.shape_cast %219 : vector<1x2x96xf32> to vector<2x96xf32>
    %cst_56 = arith.constant dense<0.000000e+00> : vector<2x96xf32>
    %221 = tpu.matmul %213, %3, %cst_56 {dimension_numbers = #tpu.dot_dimension_numbers<[1], [0], [0], [1], [0, 0, 1, 1], [], []>} : vector<2x32xf32>, vector<32x96xf32>, vector<2x96xf32> -> vector<2x96xf32>
    %222 = arith.addf %221, %6 : vector<2x96xf32>
    %223 = vector.extract_strided_slice %220 {offsets = [0, 0], sizes = [2, 32], strides = [1, 1]} : vector<2x96xf32> to vector<2x32xf32>
    %224 = vector.extract_strided_slice %222 {offsets = [0, 0], sizes = [2, 32], strides = [1, 1]} : vector<2x96xf32> to vector<2x32xf32>
    %225 = arith.addf %223, %224 : vector<2x32xf32>
    %226 = arith.negf %225 : vector<2x32xf32>
    %227 = math.exp %226 : vector<2x32xf32>
    %cst_57 = arith.constant 1.000000e+00 : f32
    %228 = vector.broadcast %cst_57 : f32 to vector<2x32xf32>
    %229 = arith.addf %228, %227 : vector<2x32xf32>
    %230 = arith.divf %228, %229 : vector<2x32xf32>
    %231 = vector.extract_strided_slice %220 {offsets = [0, 32], sizes = [2, 32], strides = [1, 1]} : vector<2x96xf32> to vector<2x32xf32>
    %232 = vector.extract_strided_slice %222 {offsets = [0, 32], sizes = [2, 32], strides = [1, 1]} : vector<2x96xf32> to vector<2x32xf32>
    %233 = arith.addf %231, %232 : vector<2x32xf32>
    %234 = arith.negf %233 : vector<2x32xf32>
    %235 = math.exp %234 : vector<2x32xf32>
    %cst_58 = arith.constant 1.000000e+00 : f32
    %236 = vector.broadcast %cst_58 : f32 to vector<2x32xf32>
    %237 = arith.addf %236, %235 : vector<2x32xf32>
    %238 = arith.divf %236, %237 : vector<2x32xf32>
    %239 = vector.extract_strided_slice %220 {offsets = [0, 64], sizes = [2, 32], strides = [1, 1]} : vector<2x96xf32> to vector<2x32xf32>
    %240 = vector.extract_strided_slice %222 {offsets = [0, 64], sizes = [2, 32], strides = [1, 1]} : vector<2x96xf32> to vector<2x32xf32>
    %241 = arith.mulf %230, %240 : vector<2x32xf32>
    %242 = arith.addf %239, %241 : vector<2x32xf32>
    %243 = math.tanh %242 : vector<2x32xf32>
    %cst_59 = arith.constant 1.000000e+00 : f32
    %244 = vector.broadcast %cst_59 : f32 to vector<2x32xf32>
    %245 = arith.subf %244, %238 : vector<2x32xf32>
    %246 = arith.mulf %245, %243 : vector<2x32xf32>
    %247 = arith.mulf %238, %213 : vector<2x32xf32>
    %248 = arith.addf %246, %247 : vector<2x32xf32>
    %249 = arith.index_cast %c6_i32 : i32 to index
    %c0_60 = arith.constant 0 : index
    %c0_61 = arith.constant 0 : index
    %250 = vector.load %arg5[%249, %c0_60, %c0_61] : memref<8x2x32xf32, #tpu.memory_space<vmem>>, vector<1x2x32xf32>
    %251 = vector.shape_cast %250 : vector<1x2x32xf32> to vector<2x32xf32>
    %252 = vector.shape_cast %248 : vector<2x32xf32> to vector<1x2x32xf32>
    tpu.vector_store %arg5[%249, %c0_60, %c0_61], %252 {strides = array<i32>} : memref<8x2x32xf32, #tpu.memory_space<vmem>>, vector<1x2x32xf32>,
    %c7_i32 = arith.constant 7 : i32
    %253 = arith.index_cast %c7_i32 : i32 to index
    %c0_62 = arith.constant 0 : index
    %c0_63 = arith.constant 0 : index
    %254 = vector.load %arg2[%253, %c0_62, %c0_63] : memref<8x2x96xf32, #tpu.memory_space<vmem>>, vector<1x2x96xf32>
    %255 = vector.shape_cast %254 : vector<1x2x96xf32> to vector<2x96xf32>
    %cst_64 = arith.constant dense<0.000000e+00> : vector<2x96xf32>
    %256 = tpu.matmul %248, %3, %cst_64 {dimension_numbers = #tpu.dot_dimension_numbers<[1], [0], [0], [1], [0, 0, 1, 1], [], []>} : vector<2x32xf32>, vector<32x96xf32>, vector<2x96xf32> -> vector<2x96xf32>
    %257 = arith.addf %256, %6 : vector<2x96xf32>
    %258 = vector.extract_strided_slice %255 {offsets = [0, 0], sizes = [2, 32], strides = [1, 1]} : vector<2x96xf32> to vector<2x32xf32>
    %259 = vector.extract_strided_slice %257 {offsets = [0, 0], sizes = [2, 32], strides = [1, 1]} : vector<2x96xf32> to vector<2x32xf32>
    %260 = arith.addf %258, %259 : vector<2x32xf32>
    %261 = arith.negf %260 : vector<2x32xf32>
    %262 = math.exp %261 : vector<2x32xf32>
    %cst_65 = arith.constant 1.000000e+00 : f32
    %263 = vector.broadcast %cst_65 : f32 to vector<2x32xf32>
    %264 = arith.addf %263, %262 : vector<2x32xf32>
    %265 = arith.divf %263, %264 : vector<2x32xf32>
    %266 = vector.extract_strided_slice %255 {offsets = [0, 32], sizes = [2, 32], strides = [1, 1]} : vector<2x96xf32> to vector<2x32xf32>
    %267 = vector.extract_strided_slice %257 {offsets = [0, 32], sizes = [2, 32], strides = [1, 1]} : vector<2x96xf32> to vector<2x32xf32>
    %268 = arith.addf %266, %267 : vector<2x32xf32>
    %269 = arith.negf %268 : vector<2x32xf32>
    %270 = math.exp %269 : vector<2x32xf32>
    %cst_66 = arith.constant 1.000000e+00 : f32
    %271 = vector.broadcast %cst_66 : f32 to vector<2x32xf32>
    %272 = arith.addf %271, %270 : vector<2x32xf32>
    %273 = arith.divf %271, %272 : vector<2x32xf32>
    %274 = vector.extract_strided_slice %255 {offsets = [0, 64], sizes = [2, 32], strides = [1, 1]} : vector<2x96xf32> to vector<2x32xf32>
    %275 = vector.extract_strided_slice %257 {offsets = [0, 64], sizes = [2, 32], strides = [1, 1]} : vector<2x96xf32> to vector<2x32xf32>
    %276 = arith.mulf %265, %275 : vector<2x32xf32>
    %277 = arith.addf %274, %276 : vector<2x32xf32>
    %278 = math.tanh %277 : vector<2x32xf32>
    %cst_67 = arith.constant 1.000000e+00 : f32
    %279 = vector.broadcast %cst_67 : f32 to vector<2x32xf32>
    %280 = arith.subf %279, %273 : vector<2x32xf32>
    %281 = arith.mulf %280, %278 : vector<2x32xf32>
    %282 = arith.mulf %273, %248 : vector<2x32xf32>
    %283 = arith.addf %281, %282 : vector<2x32xf32>
    %284 = arith.index_cast %c7_i32 : i32 to index
    %c0_68 = arith.constant 0 : index
    %c0_69 = arith.constant 0 : index
    %285 = vector.load %arg5[%284, %c0_68, %c0_69] : memref<8x2x32xf32, #tpu.memory_space<vmem>>, vector<1x2x32xf32>
    %286 = vector.shape_cast %285 : vector<1x2x32xf32> to vector<2x32xf32>
    %287 = vector.shape_cast %283 : vector<2x32xf32> to vector<1x2x32xf32>
    tpu.vector_store %arg5[%284, %c0_68, %c0_69], %287 {strides = array<i32>} : memref<8x2x32xf32, #tpu.memory_space<vmem>>, vector<1x2x32xf32>,
    %c8_i32 = arith.constant 8 : i32
    %c0_70 = arith.constant 0 : index
    %c0_71 = arith.constant 0 : index
    %288 = vector.load %arg6[%c0_70, %c0_71] : memref<2x32xf32, #tpu.memory_space<vmem>>, vector<2x32xf32>
    tpu.vector_store %arg6[%c0_70, %c0_71], %283 {strides = array<i32>} : memref<2x32xf32, #tpu.memory_space<vmem>>, vector<2x32xf32>,
    return
  }
  func.func @transform_0(%arg0: i32, %arg1: i32) -> (i32, i32, i32) {
    %c0_i32 = arith.constant 0 : i32
    %c0_i32_0 = arith.constant 0 : i32
    return %arg1, %arg0, %c0_i32 : i32, i32, i32
  }
  func.func @transform_1(%arg0: i32, %arg1: i32) -> (i32, i32) {
    %c0_i32 = arith.constant 0 : i32
    %c0_i32_0 = arith.constant 0 : i32
    %c0_i32_1 = arith.constant 0 : i32
    return %c0_i32, %c0_i32_0 : i32, i32
  }
  func.func @transform_2(%arg0: i32, %arg1: i32) -> (i32, i32) {
    %c0_i32 = arith.constant 0 : i32
    %c0_i32_0 = arith.constant 0 : i32
    %c0_i32_1 = arith.constant 0 : i32
    return %c0_i32, %c0_i32_0 : i32, i32
  }
  func.func @transform_3(%arg0: i32, %arg1: i32) -> (i32, i32, i32) {
    %c0_i32 = arith.constant 0 : i32
    %c0_i32_0 = arith.constant 0 : i32
    return %arg1, %arg0, %c0_i32 : i32, i32, i32
  }
}

</mosaic_0001>

<bundles_post_ra>
// kernel: tfr_forward.2
= control target key start
LH: loop header
LB: loop body
LE: loop exit
PB: predicated region body
PF: predicated region fallthrough
CT: control target
= control target key end

     0   :  { %vm18_vm0 = vcmask 254976   ;;  %v1150_v0 = vmov 0.0|0.0   ;;  %vm1151_vm1 = vmmov 0   ;;  %v1152_v4 = vmov 0.0   ;;  %s1153_s21 = smov 64   ;;  %s1155_s24 = smov 32   ;;  %s1352_s1 = inlined_call_operand.vmem [shape: f32[32,96], index: 1, kind: input, shape index: {}]   ;;  %s1353_s2 = inlined_call_operand.vmem [shape: f32[1,96], index: 2, kind: input, shape index: {}]   ;;  %s1354_s0 = inlined_call_operand.vmem [shape: f32[8,2,96], index: 0, kind: input, shape index: {}]   ;;  %s1355_s3 = inlined_call_operand.vmem [shape: f32[8,2,32], index: 3, kind: output, shape index: {}]  }
   0x1   :  { %1048 = vmatprep.subr.bf16.mxu0 %v1150_v0  ;;  %v20_v1 = vld [vmem:[%s1352_s1] sm:$0xff]  ;;  %v21_v2 = vld [vmem:[%s1352_s1 + $0x8] sm:$0xff]  ;;  %v22_v3 = vld [vmem:[%s1352_s1 + $0x10] sm:$0xff]  ;;  %968 = vmatprep.mubr.msk.f32.mxu0 %vm1151_vm1, %v1152_v4  ;;  %19 = vst.msk [vmem:[#allocation2] sm:$0x3] %vm18_vm0, %v1152_v4  ;;  %vm33_vm2 = vcmask 261120  }
   0x2   :  { %v1190_v5 = vpack.c.bf16 %v21_v2, %v20_v1  ;;  %v23_v6 = vld [vmem:[%s1352_s1 + $0x18] sm:$0xff]  ;;  %1054 = vmatprep.subr.bf16.mxu1 %v1150_v0  ;;  %979 = vmatprep.mubr.msk.f32.mxu1 %vm1151_vm1, %v1152_v4  ;;  %v1218_v9 = vld [vmem:[%s1353_s2] ss:$0 sm:$0xff]  ;;  %s1154_s2 = smov 96   ;;  %v892_v34 = vld [vmem:[%s1354_s0 + $0x2] sm:$0x3] }
   0x3   :  { %v1199_v7 = vpack.c.bf16 %v23_v6, %v22_v3  ;;  %v32_v13 = vld [vmem:[%s1354_s0] sm:$0x3]  ;;  %v896_v54 = vld [vmem:[%s1354_s0 + $0x4] sm:$0x3] }
   0x4   :  { %1050 = vmatpush3.bf16.msra.mxu0 %v1190_v5  ;;  %1056 = vmatpush3.bf16.msra.mxu1 %v1190_v5 }
   0x5   :  { %1051 = vmatprep.subr.bf16.mxu0 %v1150_v0  ;;  %1057 = vmatprep.subr.bf16.mxu1 %v1150_v0 }
   0x8   :  { %1053 = vmatpush3.bf16.msra.mxu0 %v1199_v7  ;;  %v31_v8 = vld [vmem:[#allocation2] sm:$0x3]  ;;  %1059 = vmatpush3.bf16.msra.mxu1 %v1199_v7 }
   0x9   :  { %1060 = vmatprep.subr.bf16.mxu0 %v1150_v0  ;;  %1066 = vmatprep.subr.bf16.mxu1 %v1150_v0 }
   0xb   :  { %969 = vmatmul.mubr.msk.f32.vlgmr.msra.gmra.mrb[0].mxu0 %vm33_vm2, %v31_v8 }
   0xc   :  { %1062 = vmatpush3.bf16.msra.mxu0 %v1190_v5  ;;  %990 = vmatprep.mubr.msk.f32.mxu0 %vm1151_vm1, %v1152_v4 }
   0xd   :  { %1063 = vmatprep.subr.bf16.mxu0 %v1150_v0 }
  0x10   :  { %1065 = vmatpush3.bf16.msra.mxu0 %v1199_v7 }
  0x11   :  { %1072 = vmatprep.subr.bf16.mxu0 %v1150_v0 }
  0xde   :  { %v103_v10 = vpop.f32.mrb[0].mxu0 }
  0xdf   :  { %v104_v11 = vadd.f32 %v1218_v9, %v103_v10  ;;  %v970_v12 = vpop.f32.mrb[1].mxu0 }
  0xe1   :  { %115 = vrot.lane.b32.xlu0 %v104_v11, %s1153_s21  ;;  %v107_v14 = vadd.f32 %v104_v11, %v32_v13 }
  0xe3   :  { %v891_v15 = vmul.f32 -1.442695, %v107_v14 }
  0xe5   :  { %1102 = vpow2.f32 %v891_v15  ;;  %v900_v15 = vld [vmem:[%s1354_s0 + $0x6] sm:$0x3] }
  0xef   :  { %v1103_v16 = vpop.eup %1102 }
  0xf0   :  { %v111_v17 = vadd.f32 1.0, %v1103_v16 }
  0xf2   :  { %1104 = vrcp.f32 %v111_v17 }
  0xfc   :  { %v1105_v18 = vpop.eup %1104 }
  0xfd   :  { %v125_v25 = vsub.f32 1.0, %v1105_v18 }
 0x153   :  { %v116_v19 = vpop.permute.xlu0 %115 }
 0x154   :  { %v118_v20 = vmul.f32 %v1105_v18, %v116_v19 }
 0x156   :  { %120 = vrot.lane.b32.xlu0 %v118_v20, %s1153_s21 }
 0x1c8   :  { %v121_v21 = vpop.permute.xlu0 %120 }
 0x1c9   :  { %v123_v22 = vadd.f32 %v121_v21, %v32_v13 }
 0x1cb   :  { %1106 = vtanh.f32 %v123_v22 }
 0x1d5   :  { %v1107_v23 = vpop.eup %1106 }
 0x1d6   :  { %127 = vrot.lane.b32.xlu1 %v1107_v23, %s1154_s2 }
 0x1da   :  { %131 = vrot.lane.b32.xlu1 %v31_v8, %s1155_s24 }
 0x248   :  { %v128_v24 = vpop.permute.xlu1 %127 }
 0x249   :  { %v130_v27 = vmul.f32 %v128_v24, %v125_v25 }
 0x24c   :  { %v132_v26 = vpop.permute.xlu1 %131 }
 0x24d   :  { %v134_v28 = vmul.f32 %v1105_v18, %v132_v26 }
 0x24f   :  { %v135_v29 = vadd.f32 %v134_v28, %v130_v27 }
 0x251   :  { %137 = vrot.lane.b32.xlu0 %v135_v29, %s1154_s2 }
 0x2c3   :  { %v138_v30 = vpop.permute.xlu0 %137 }
 0x2c4   :  { %141 = vst.msk [vmem:[%s1355_s3] sm:$0x3] %vm18_vm0, %v138_v30  ;;  %980 = vmatmul.mubr.msk.f32.vlgmr.msra.gmra.mrb[0].mxu1 %vm33_vm2, %v138_v30 }
 0x2c5   :  { %1068 = vmatpush3.bf16.msra.mxu1 %v1190_v5  ;;  %1001 = vmatprep.mubr.msk.f32.mxu1 %vm1151_vm1, %v1152_v4 }
 0x2c6   :  { %1069 = vmatprep.subr.bf16.mxu1 %v1150_v0 }
 0x2c9   :  { %1071 = vmatpush3.bf16.msra.mxu1 %v1199_v7 }
 0x2ca   :  { %1078 = vmatprep.subr.bf16.mxu1 %v1150_v0 }
 0x397   :  { %v212_v31 = vpop.f32.mrb[0].mxu1 }
 0x398   :  { %v213_v32 = vadd.f32 %v1218_v9, %v212_v31  ;;  %v981_v33 = vpop.f32.mrb[1].mxu1 }
 0x39a   :  { %224 = vrot.lane.b32.xlu1 %v213_v32, %s1153_s21  ;;  %v216_v35 = vadd.f32 %v892_v34, %v213_v32 }
 0x39c   :  { %v894_v36 = vmul.f32 -1.442695, %v216_v35  ;;  %v904_v35 = vld [vmem:[%s1354_s0 + $0x8] sm:$0x3] }
 0x39e   :  { %1108 = vpow2.f32 %v894_v36 }
 0x3a8   :  { %v1109_v37 = vpop.eup %1108 }
 0x3a9   :  { %v220_v38 = vadd.f32 1.0, %v1109_v37 }
 0x3ab   :  { %1110 = vrcp.f32 %v220_v38 }
 0x3b5   :  { %v1111_v39 = vpop.eup %1110 }
 0x3b6   :  { %v234_v45 = vsub.f32 1.0, %v1111_v39  ;;  %v240_v47 = vmul.f32 %v1111_v39, %v135_v29 }
 0x40c   :  { %v225_v40 = vpop.permute.xlu1 %224 }
 0x40d   :  { %v227_v41 = vmul.f32 %v1111_v39, %v225_v40 }
 0x40f   :  { %229 = vrot.lane.b32.xlu0 %v227_v41, %s1153_s21 }
 0x481   :  { %v230_v42 = vpop.permute.xlu0 %229 }
 0x482   :  { %v232_v43 = vadd.f32 %v892_v34, %v230_v42 }
 0x484   :  { %1112 = vtanh.f32 %v232_v43 }
 0x48e   :  { %v1113_v44 = vpop.eup %1112 }
 0x48f   :  { %236 = vrot.lane.b32.xlu1 %v1113_v44, %s1154_s2 }
 0x501   :  { %v237_v46 = vpop.permute.xlu1 %236 }
 0x502   :  { %v239_v48 = vmul.f32 %v237_v46, %v234_v45 }
 0x504   :  { %v241_v49 = vadd.f32 %v240_v47, %v239_v48 }
 0x506   :  { %243 = vrot.lane.b32.xlu0 %v241_v49, %s1154_s2 }
 0x578   :  { %v244_v50 = vpop.permute.xlu0 %243 }
 0x579   :  { %895 = vst.msk [vmem:[%s1355_s3 + $0x2] sm:$0x3] %vm18_vm0, %v244_v50  ;;  %991 = vmatmul.mubr.msk.f32.vlgmr.msra.gmra.mrb[2].mxu0 %vm33_vm2, %v244_v50 }
 0x57a   :  { %1074 = vmatpush3.bf16.msra.mxu0 %v1190_v5  ;;  %1012 = vmatprep.mubr.msk.f32.mxu0 %vm1151_vm1, %v1152_v4 }
 0x57b   :  { %1075 = vmatprep.subr.bf16.mxu0 %v1150_v0 }
 0x57e   :  { %1077 = vmatpush3.bf16.msra.mxu0 %v1199_v7 }
 0x57f   :  { %1084 = vmatprep.subr.bf16.mxu0 %v1150_v0 }
 0x64c   :  { %v318_v51 = vpop.f32.mrb[2].mxu0 }
 0x64d   :  { %v319_v52 = vadd.f32 %v1218_v9, %v318_v51  ;;  %v992_v53 = vpop.f32.mrb[3].mxu0 }
 0x64f   :  { %330 = vrot.lane.b32.xlu1 %v319_v52, %s1153_s21  ;;  %v322_v55 = vadd.f32 %v896_v54, %v319_v52 }
 0x651   :  { %v898_v56 = vmul.f32 -1.442695, %v322_v55  ;;  %v908_v55 = vld [vmem:[%s1354_s0 + $0xa] sm:$0x3] }
 0x653   :  { %1114 = vpow2.f32 %v898_v56 }
 0x65d   :  { %v1115_v57 = vpop.eup %1114 }
 0x65e   :  { %v326_v58 = vadd.f32 1.0, %v1115_v57 }
 0x660   :  { %1116 = vrcp.f32 %v326_v58 }
 0x66a   :  { %v1117_v59 = vpop.eup %1116 }
 0x66b   :  { %v340_v2 = vsub.f32 1.0, %v1117_v59  ;;  %v346_v6 = vmul.f32 %v1117_v59, %v241_v49 }
 0x6c1   :  { %v331_v60 = vpop.permute.xlu1 %330 }
 0x6c2   :  { %v333_v61 = vmul.f32 %v1117_v59, %v331_v60 }
 0x6c4   :  { %335 = vrot.lane.b32.xlu0 %v333_v61, %s1153_s21 }
 0x736   :  { %v336_v62 = vpop.permute.xlu0 %335 }
 0x737   :  { %v338_v63 = vadd.f32 %v896_v54, %v336_v62 }
 0x739   :  { %1118 = vtanh.f32 %v338_v63 }
 0x743   :  { %v1119_v1 = vpop.eup %1118 }
 0x744   :  { %342 = vrot.lane.b32.xlu1 %v1119_v1, %s1154_s2 }
 0x7b6   :  { %v343_v3 = vpop.permute.xlu1 %342 }
 0x7b7   :  { %v345_v8 = vmul.f32 %v343_v3, %v340_v2 }
 0x7b9   :  { %v347_v10 = vadd.f32 %v346_v6, %v345_v8 }
 0x7bb   :  { %349 = vrot.lane.b32.xlu0 %v347_v10, %s1154_s2 }
 0x82d   :  { %v350_v11 = vpop.permute.xlu0 %349 }
 0x82e   :  { %899 = vst.msk [vmem:[%s1355_s3 + $0x4] sm:$0x3] %vm18_vm0, %v350_v11  ;;  %1002 = vmatmul.mubr.msk.f32.vlgmr.msra.gmra.mrb[2].mxu1 %vm33_vm2, %v350_v11 }
 0x82f   :  { %1080 = vmatpush3.bf16.msra.mxu1 %v1190_v5  ;;  %1023 = vmatprep.mubr.msk.f32.mxu1 %vm1151_vm1, %v1152_v4 }
 0x830   :  { %1081 = vmatprep.subr.bf16.mxu1 %v1150_v0 }
 0x833   :  { %1083 = vmatpush3.bf16.msra.mxu1 %v1199_v7 }
 0x834   :  { %1090 = vmatprep.subr.bf16.mxu1 %v1150_v0 }
 0x901   :  { %v424_v12 = vpop.f32.mrb[2].mxu1 }
 0x902   :  { %v425_v13 = vadd.f32 %v1218_v9, %v424_v12  ;;  %v1003_v14 = vpop.f32.mrb[3].mxu1  ;;  %v912_v12 = vld [vmem:[%s1354_s0 + $0xc] sm:$0x3] }
 0x904   :  { %436 = vrot.lane.b32.xlu1 %v425_v13, %s1153_s21  ;;  %v428_v16 = vadd.f32 %v900_v15, %v425_v13 }
 0x906   :  { %v902_v17 = vmul.f32 -1.442695, %v428_v16 }
 0x908   :  { %1120 = vpow2.f32 %v902_v17 }
 0x912   :  { %v1121_v18 = vpop.eup %1120 }
 0x913   :  { %v432_v19 = vadd.f32 1.0, %v1121_v18 }
 0x915   :  { %1122 = vrcp.f32 %v432_v19 }
 0x91f   :  { %v1123_v20 = vpop.eup %1122 }
 0x920   :  { %v446_v26 = vsub.f32 1.0, %v1123_v20  ;;  %v452_v28 = vmul.f32 %v1123_v20, %v347_v10 }
 0x976   :  { %v437_v21 = vpop.permute.xlu1 %436 }
 0x977   :  { %v439_v22 = vmul.f32 %v1123_v20, %v437_v21 }
 0x979   :  { %441 = vrot.lane.b32.xlu0 %v439_v22, %s1153_s21 }
 0x9eb   :  { %v442_v23 = vpop.permute.xlu0 %441 }
 0x9ec   :  { %v444_v24 = vadd.f32 %v900_v15, %v442_v23 }
 0x9ee   :  { %1124 = vtanh.f32 %v444_v24 }
 0x9f8   :  { %v1125_v25 = vpop.eup %1124 }
 0x9f9   :  { %448 = vrot.lane.b32.xlu1 %v1125_v25, %s1154_s2 }
 0xa6b   :  { %v449_v27 = vpop.permute.xlu1 %448 }
 0xa6c   :  { %v451_v29 = vmul.f32 %v449_v27, %v446_v26 }
 0xa6e   :  { %v453_v30 = vadd.f32 %v452_v28, %v451_v29 }
 0xa70   :  { %455 = vrot.lane.b32.xlu0 %v453_v30, %s1154_s2 }
 0xae2   :  { %v456_v31 = vpop.permute.xlu0 %455 }
 0xae3   :  { %903 = vst.msk [vmem:[%s1355_s3 + $0x6] sm:$0x3] %vm18_vm0, %v456_v31  ;;  %1013 = vmatmul.mubr.msk.f32.vlgmr.msra.gmra.mrb[4].mxu0 %vm33_vm2, %v456_v31 }
 0xae4   :  { %1086 = vmatpush3.bf16.msra.mxu0 %v1190_v5  ;;  %1034 = vmatprep.mubr.msk.f32.mxu0 %vm1151_vm1, %v1152_v4 }
 0xae5   :  { %1087 = vmatprep.subr.bf16.mxu0 %v1150_v0 }
 0xae8   :  { %1089 = vmatpush3.bf16.msra.mxu0 %v1199_v7 }
 0xbb6   :  { %v530_v32 = vpop.f32.mrb[4].mxu0 }
 0xbb7   :  { %v531_v33 = vadd.f32 %v1218_v9, %v530_v32  ;;  %v1014_v34 = vpop.f32.mrb[5].mxu0  ;;  %v916_v32 = vld [vmem:[%s1354_s0 + $0xe] sm:$0x3] }
 0xbb9   :  { %542 = vrot.lane.b32.xlu1 %v531_v33, %s1153_s21  ;;  %v534_v36 = vadd.f32 %v904_v35, %v531_v33 }
 0xbbb   :  { %v906_v37 = vmul.f32 -1.442695, %v534_v36 }
 0xbbd   :  { %1126 = vpow2.f32 %v906_v37 }
 0xbc7   :  { %v1127_v38 = vpop.eup %1126 }
 0xbc8   :  { %v538_v39 = vadd.f32 1.0, %v1127_v38 }
 0xbca   :  { %1128 = vrcp.f32 %v538_v39 }
 0xbd4   :  { %v1129_v40 = vpop.eup %1128 }
 0xbd5   :  { %v552_v46 = vsub.f32 1.0, %v1129_v40  ;;  %v558_v48 = vmul.f32 %v1129_v40, %v453_v30 }
 0xc2b   :  { %v543_v41 = vpop.permute.xlu1 %542 }
 0xc2c   :  { %v545_v42 = vmul.f32 %v1129_v40, %v543_v41 }
 0xc2e   :  { %547 = vrot.lane.b32.xlu0 %v545_v42, %s1153_s21 }
 0xca0   :  { %v548_v43 = vpop.permute.xlu0 %547 }
 0xca1   :  { %v550_v44 = vadd.f32 %v904_v35, %v548_v43 }
 0xca3   :  { %1130 = vtanh.f32 %v550_v44 }
 0xcad   :  { %v1131_v45 = vpop.eup %1130 }
 0xcae   :  { %554 = vrot.lane.b32.xlu1 %v1131_v45, %s1154_s2 }
 0xd20   :  { %v555_v47 = vpop.permute.xlu1 %554 }
 0xd21   :  { %v557_v49 = vmul.f32 %v555_v47, %v552_v46 }
 0xd23   :  { %v559_v50 = vadd.f32 %v558_v48, %v557_v49 }
 0xd25   :  { %561 = vrot.lane.b32.xlu0 %v559_v50, %s1154_s2 }
 0xd97   :  { %v562_v51 = vpop.permute.xlu0 %561 }
 0xd98   :  { %907 = vst.msk [vmem:[%s1355_s3 + $0x8] sm:$0x3] %vm18_vm0, %v562_v51  ;;  %1024 = vmatmul.mubr.msk.f32.vlgmr.msra.gmra.mrb[4].mxu1 %vm33_vm2, %v562_v51 }
 0xd99   :  { %1092 = vmatpush3.bf16.msra.mxu1 %v1190_v5  ;;  %1045 = vmatprep.mubr.msk.f32.mxu1 %vm1151_vm1, %v1152_v4 }
 0xd9a   :  { %1093 = vmatprep.subr.bf16.mxu1 %v1150_v0 }
 0xd9d   :  { %1095 = vmatpush3.bf16.msra.mxu1 %v1199_v7 }
 0xe6b   :  { %v636_v52 = vpop.f32.mrb[4].mxu1 }
 0xe6c   :  { %v637_v53 = vadd.f32 %v1218_v9, %v636_v52  ;;  %v1025_v54 = vpop.f32.mrb[5].mxu1 }
 0xe6e   :  { %648 = vrot.lane.b32.xlu1 %v637_v53, %s1153_s21  ;;  %v640_v56 = vadd.f32 %v908_v55, %v637_v53 }
 0xe70   :  { %v910_v57 = vmul.f32 -1.442695, %v640_v56 }
 0xe72   :  { %1132 = vpow2.f32 %v910_v57 }
 0xe7c   :  { %v1133_v5 = vpop.eup %1132 }
 0xe7d   :  { %v644_v58 = vadd.f32 1.0, %v1133_v5 }
 0xe7f   :  { %1134 = vrcp.f32 %v644_v58 }
 0xe89   :  { %v1135_v4 = vpop.eup %1134 }
 0xe8a   :  { %v658_v62 = vsub.f32 1.0, %v1135_v4  ;;  %v664_v1 = vmul.f32 %v1135_v4, %v559_v50 }
 0xee0   :  { %v649_v0 = vpop.permute.xlu1 %648 }
 0xee1   :  { %v651_v59 = vmul.f32 %v1135_v4, %v649_v0 }
 0xee3   :  { %653 = vrot.lane.b32.xlu0 %v651_v59, %s1153_s21 }
 0xf55   :  { %v654_v7 = vpop.permute.xlu0 %653 }
 0xf56   :  { %v656_v60 = vadd.f32 %v908_v55, %v654_v7 }
 0xf58   :  { %1136 = vtanh.f32 %v656_v60 }
 0xf62   :  { %v1137_v61 = vpop.eup %1136 }
 0xf63   :  { %660 = vrot.lane.b32.xlu1 %v1137_v61, %s1154_s2 }
 0xfd5   :  { %v661_v63 = vpop.permute.xlu1 %660 }
 0xfd6   :  { %v663_v2 = vmul.f32 %v661_v63, %v658_v62 }
 0xfd8   :  { %v665_v3 = vadd.f32 %v664_v1, %v663_v2 }
 0xfda   :  { %667 = vrot.lane.b32.xlu0 %v665_v3, %s1154_s2 }
0x104c   :  { %v668_v6 = vpop.permute.xlu0 %667 }
0x104d   :  { %911 = vst.msk [vmem:[%s1355_s3 + $0xa] sm:$0x3] %vm18_vm0, %v668_v6  ;;  %1035 = vmatmul.mubr.msk.f32.vlgmr.msra.gmra.mrb[6].mxu0 %vm33_vm2, %v668_v6 }
0x1120   :  { %v742_v8 = vpop.f32.mrb[6].mxu0 }
0x1121   :  { %v743_v10 = vadd.f32 %v1218_v9, %v742_v8  ;;  %v1036_v11 = vpop.f32.mrb[7].mxu0 }
0x1123   :  { %754 = vrot.lane.b32.xlu1 %v743_v10, %s1153_s21  ;;  %v746_v13 = vadd.f32 %v912_v12, %v743_v10 }
0x1125   :  { %v914_v14 = vmul.f32 -1.442695, %v746_v13 }
0x1127   :  { %1138 = vpow2.f32 %v914_v14 }
0x1131   :  { %v1139_v15 = vpop.eup %1138 }
0x1132   :  { %v750_v16 = vadd.f32 1.0, %v1139_v15 }
0x1134   :  { %1140 = vrcp.f32 %v750_v16 }
0x113e   :  { %v1141_v17 = vpop.eup %1140 }
0x113f   :  { %v764_v23 = vsub.f32 1.0, %v1141_v17  ;;  %v770_v25 = vmul.f32 %v1141_v17, %v665_v3 }
0x1195   :  { %v755_v18 = vpop.permute.xlu1 %754 }
0x1196   :  { %v757_v19 = vmul.f32 %v1141_v17, %v755_v18 }
0x1198   :  { %759 = vrot.lane.b32.xlu0 %v757_v19, %s1153_s21 }
0x120a   :  { %v760_v20 = vpop.permute.xlu0 %759 }
0x120b   :  { %v762_v21 = vadd.f32 %v912_v12, %v760_v20 }
0x120d   :  { %1142 = vtanh.f32 %v762_v21 }
0x1217   :  { %v1143_v22 = vpop.eup %1142 }
0x1218   :  { %766 = vrot.lane.b32.xlu1 %v1143_v22, %s1154_s2 }
0x128a   :  { %v767_v24 = vpop.permute.xlu1 %766 }
0x128b   :  { %v769_v26 = vmul.f32 %v767_v24, %v764_v23 }
0x128d   :  { %v771_v27 = vadd.f32 %v770_v25, %v769_v26 }
0x128f   :  { %773 = vrot.lane.b32.xlu0 %v771_v27, %s1154_s2 }
0x1301   :  { %v774_v28 = vpop.permute.xlu0 %773 }
0x1302   :  { %915 = vst.msk [vmem:[%s1355_s3 + $0xc] sm:$0x3] %vm18_vm0, %v774_v28  ;;  %1046 = vmatmul.mubr.msk.f32.vlgmr.msra.gmra.mrb[6].mxu1 %vm33_vm2, %v774_v28 }
0x13d5   :  { %v848_v29 = vpop.f32.mrb[6].mxu1 }
0x13d6   :  { %v849_v30 = vadd.f32 %v1218_v9, %v848_v29  ;;  %v1047_v31 = vpop.f32.mrb[7].mxu1 }
0x13d8   :  { %860 = vrot.lane.b32.xlu1 %v849_v30, %s1153_s21  ;;  %v852_v33 = vadd.f32 %v916_v32, %v849_v30 }
0x13da   :  { %v918_v34 = vmul.f32 -1.442695, %v852_v33 }
0x13dc   :  { %1144 = vpow2.f32 %v918_v34 }
0x13e6   :  { %v1145_v35 = vpop.eup %1144 }
0x13e7   :  { %v856_v36 = vadd.f32 1.0, %v1145_v35 }
0x13e9   :  { %1146 = vrcp.f32 %v856_v36 }
0x13f3   :  { %v1147_v37 = vpop.eup %1146 }
0x13f4   :  { %v870_v42 = vsub.f32 1.0, %v1147_v37  ;;  %v876_v44 = vmul.f32 %v1147_v37, %v771_v27 }
0x144a   :  { %v861_v38 = vpop.permute.xlu1 %860 }
0x144b   :  { %v863_v39 = vmul.f32 %v1147_v37, %v861_v38 }
0x144d   :  { %865 = vrot.lane.b32.xlu0 %v863_v39, %s1153_s21 }
0x14bf   :  { %v866_v40 = vpop.permute.xlu0 %865 }
0x14c0   :  { %v868_v9 = vadd.f32 %v916_v32, %v866_v40 }
0x14c2   :  { %1148 = vtanh.f32 %v868_v9 }
0x14cc   :  { %v1149_v41 = vpop.eup %1148 }
0x14cd   :  { %872 = vrot.lane.b32.xlu1 %v1149_v41, %s1154_s2 }
0x153f   :  { %v873_v43 = vpop.permute.xlu1 %872 }
0x1540   :  { %v875_v45 = vmul.f32 %v873_v43, %v870_v42 }
0x1542   :  { %v877_v46 = vadd.f32 %v876_v44, %v875_v45 }
0x1544   :  { %879 = vrot.lane.b32.xlu0 %v877_v46, %s1154_s2 }
0x15b6   :  { %v880_v47 = vpop.permute.xlu0 %879 }
0x15b7   :  { %919 = vst.msk [vmem:[%s1355_s3 + $0xe] sm:$0x3] %vm18_vm0, %v880_v47  ;;  %884 = vst.msk [vmem:[#allocation2] sm:$0x3] %vm18_vm0, %v880_v47 }

</bundles_post_ra>
